<compile_context>
chip_gen: v6e
topology: v6e:2x2x1
jax: 0.10.0
libtpu: 0.0.40
codegen_flags: <defaults>
</compile_context>

<pallas_src>
import math
from functools import partial

import jax
import jax.numpy as jnp
from jax import lax
from jax.experimental import pallas as pl
from jax.experimental.pallas import tpu as pltpu


def _round_up(n: int, m: int) -> int:
    return ((n + m - 1) // m) * m


def _default_block_b(B: int) -> int:
    """Pick the batch-tile size.

    Large tiles amortize per-grid-step overhead (~0.35 us) and keep the DMA engine
    busy (the kernel is HBM-bandwidth bound). Once there is enough work (B > 128)
    keep at least two grid steps so megacore (v7x, 2 TCs) can shard the 'parallel'
    batch axis across cores; cap at 4096 rows for very large B (per review: 2048-row
    steps on v7x HBM are ~45% per-step overhead, 4096 drops that to <~25%).
    """
    if B <= 128:
        return B                                   # single tile; too little to split
    if B <= 8192:
        return _round_up(pl.cdiv(B, 2), 8)         # exactly 2 grid steps
    return 4096                                    # big tiles, many parallel steps


def _to(x, dtype):
    """Cast only when needed (inputs may already arrive in compute_dtype from the producer)."""
    return x if x.dtype == dtype else x.astype(dtype)


def _mlp_mapper_kernel(x_ref, w1_ref, b1_ref, w2_ref, b2_ref, o_ref, *,
                       compute_dtype, precision):
    # fc1: (TB, dim_in) @ (dim_in, dim_hidden) on the MXU, f32 accumulation.
    x = _to(x_ref[...], compute_dtype)
    w1 = _to(w1_ref[...], compute_dtype)
    h = jnp.dot(x, w1, preferred_element_type=jnp.float32, precision=precision)
    # bias add + ReLU in f32 on the VPU (no bf16 VALU on v5e).
    h = jnp.maximum(h + _to(b1_ref[...], jnp.float32), 0.0)
    # Feed fc2 in the MXU-native dtype (halves intermediate vreg/VMEM footprint).
    h = _to(h, compute_dtype)
    # fc2: (TB, dim_hidden) @ (dim_hidden, dim_out_padded), f32 accumulation.
    w2 = _to(w2_ref[...], compute_dtype)
    y = jnp.dot(h, w2, preferred_element_type=jnp.float32, precision=precision)
    y = y + _to(b2_ref[...], jnp.float32)
    o_ref[...] = y.astype(o_ref.dtype)


def mlp_mapper_forward(feat, w1, b1, w2, b2, *, num_mixture, dim_in,
                       block_b=None, compute_dtype=jnp.bfloat16,
                       out_dtype=jnp.bfloat16, weight_buffering=None):
    """feat: (B, dim_in) -> (B, num_mixture, dim_in), matching PyTorch MLPMapper.

    compute_dtype: dtype of the MXU operands (bf16 default; jnp.float32 for
        bit-faithful f32 math -- uses precision=HIGHEST on the MXU).
    out_dtype: output dtype. bf16 by default (output is ~80% of HBM traffic on this
        mem-bound kernel); pass jnp.float32 to match the PyTorch module's dtype.
    weight_buffering: optional buffer count for the grid-invariant weight/bias
        BlockSpecs (1 drops their double-buffer; None keeps Pallas defaults).
    """
    B, d_in = feat.shape
    assert d_in == dim_in
    dim_hidden = w1.shape[1]
    dim_out = dim_in * num_mixture
    assert w2.shape == (dim_hidden, dim_out), (w2.shape, (dim_hidden, dim_out))

    # Lane-dense output: pad dim_out up to a multiple of 128 so stores are unmasked
    # vst (masked vst.msk partial stores are ~4.5x slower); slice back afterwards.
    # Zero-padded W2/b2 columns produce zero outputs that are sliced off.
    dim_out_p = _round_up(dim_out, 128)
    if dim_out_p != dim_out:
        w2 = jnp.pad(w2, ((0, 0), (0, dim_out_p - dim_out)))
        b2 = jnp.pad(b2, (0, dim_out_p - dim_out))

    # Biases as 2-D rows so they broadcast over the batch tile inside the kernel.
    b1_2d = b1.reshape(1, dim_hidden)
    b2_2d = b2.reshape(1, dim_out_p)

    if block_b is None:
        block_b = _default_block_b(B)
    block_b = min(block_b, B)
    if block_b < B:
        block_b = _round_up(block_b, 8)   # sublane-aligned partial tiles

    grid = (pl.cdiv(B, block_b),)

    # f32 compute: force a true multi-pass f32 MXU matmul.
    precision = lax.Precision.HIGHEST if jnp.dtype(compute_dtype) == jnp.float32 else None

    weight_spec_kwargs = {}
    if weight_buffering is not None:
        weight_spec_kwargs["pipeline_mode"] = pl.Buffered(weight_buffering)

    itemsize = lambda dt: jnp.dtype(dt).itemsize
    flops = 2 * B * (dim_in * dim_hidden + dim_hidden * dim_out_p)
    bytes_accessed = (B * dim_in * itemsize(feat.dtype)
                      + B * dim_out_p * itemsize(out_dtype)
                      + w1.size * itemsize(w1.dtype) + b1_2d.size * itemsize(b1.dtype)
                      + w2.size * itemsize(w2.dtype) + b2_2d.size * itemsize(b2.dtype))

    # TODO(synk): on v7x, verify with xprof that the 'parallel' batch axis actually
    # shards across both TensorCores; if not, switch to pltpu.CORE_PARALLEL / an
    # explicit leading core axis (this kernel is per-TC HBM-bandwidth bound).
    out = pl.pallas_call(
        partial(_mlp_mapper_kernel, compute_dtype=compute_dtype, precision=precision),
        out_shape=jax.ShapeDtypeStruct((B, dim_out_p), out_dtype),
        grid_spec=pltpu.PrefetchScalarGridSpec(
            num_scalar_prefetch=0,
            grid=grid,
            in_specs=[
                # Batch-tiled activations.
                pl.BlockSpec((block_b, dim_in), lambda i: (i, 0)),
                # Grid-invariant weights/biases (never re-fetched across steps).
                pl.BlockSpec((dim_in, dim_hidden), lambda i: (0, 0), **weight_spec_kwargs),
                pl.BlockSpec((1, dim_hidden), lambda i: (0, 0), **weight_spec_kwargs),
                pl.BlockSpec((dim_hidden, dim_out_p), lambda i: (0, 0), **weight_spec_kwargs),
                pl.BlockSpec((1, dim_out_p), lambda i: (0, 0), **weight_spec_kwargs),
            ],
            out_specs=pl.BlockSpec((block_b, dim_out_p), lambda i: (i, 0)),
        ),
        compiler_params=pltpu.CompilerParams(
            dimension_semantics=("parallel",),
        ),
        cost_estimate=pl.CostEstimate(
            flops=flops, transcendentals=0, bytes_accessed=bytes_accessed),
    )(feat, w1, b1_2d, w2, b2_2d)

    if dim_out_p != dim_out:
        # Extra output pass -- only taken when dim_out is not a multiple of 128.
        out = out[:, :dim_out]
    # x.view(-1, num_mixture, dim_in) -- row-major reshape, same as torch.
    return out.reshape(-1, num_mixture, dim_in)


def init_mlp_mapper_params(key, dim_in, num_mixture, dtype=jnp.float32):
    """Deterministic synthetic init mimicking nn.Linear's uniform(-1/sqrt(fan_in), +)."""
    dim_hidden = dim_in * math.floor(num_mixture / 2)
    dim_out = dim_in * num_mixture
    k1, k2, k3, k4 = jax.random.split(key, 4)
    bound1 = 1.0 / math.sqrt(dim_in)
    bound2 = 1.0 / math.sqrt(dim_hidden)
    # Stored as (in_features, out_features) -- transposed relative to PyTorch layout.
    w1 = jax.random.uniform(k1, (dim_in, dim_hidden), dtype, -bound1, bound1)
    b1 = jax.random.uniform(k2, (dim_hidden,), dtype, -bound1, bound1)
    w2 = jax.random.uniform(k3, (dim_hidden, dim_out), dtype, -bound2, bound2)
    b2 = jax.random.uniform(k4, (dim_out,), dtype, -bound2, bound2)
    return w1, b1, w2, b2


if __name__ == "__main__":
    key = jax.random.PRNGKey(0)
    k_feat, k_params = jax.random.split(key)

    # -------- Config A: dim_in=32, num_mixture=4 (dim_hidden=64, dim_out=128) --------
    dim_in, num_mixture = 32, 4
    w1, b1, w2, b2 = init_mlp_mapper_params(k_params, dim_in, num_mixture)

    def ref_fn(feat, w1, b1, w2, b2, nm, di):
        y = jnp.maximum(feat @ w1 + b1, 0.0) @ w2 + b2
        return y.reshape(-1, nm, di)

    # 1) Small single-tile batch, pure-f32 compute + f32 output: bit-faithful path.
    batch = 8
    feat = jax.random.normal(jax.random.fold_in(k_feat, 0), (batch, dim_in), jnp.float32)
    fwd_f32 = jax.jit(partial(mlp_mapper_forward, num_mixture=num_mixture, dim_in=dim_in,
                              compute_dtype=jnp.float32, out_dtype=jnp.float32))
    out = fwd_f32(feat, w1, b1, w2, b2)
    jax.block_until_ready(out)
    assert out.shape == (batch, num_mixture, dim_in), out.shape
    assert out.dtype == jnp.float32
    ref = ref_fn(feat, w1, b1, w2, b2, num_mixture, dim_in)
    assert jnp.allclose(out, ref, atol=1e-5, rtol=1e-5), "f32 mismatch vs reference"

    # 2) Multi-tile batch (2 grid steps, B not a multiple of 8 or block_b -> masked
    #    tail), default bf16 MXU operands + bf16 output.
    batch = 203
    feat = jax.random.normal(jax.random.fold_in(k_feat, 1), (batch, dim_in), jnp.float32)
    fwd_def = jax.jit(partial(mlp_mapper_forward, num_mixture=num_mixture, dim_in=dim_in))
    out = fwd_def(feat, w1, b1, w2, b2)
    jax.block_until_ready(out)
    assert out.shape == (batch, num_mixture, dim_in), out.shape
    assert out.dtype == jnp.bfloat16
    ref = ref_fn(feat, w1, b1, w2, b2, num_mixture, dim_in)
    assert jnp.allclose(out.astype(jnp.float32), ref, atol=5e-2, rtol=5e-2), \
        "bf16 mismatch vs reference"

    # 3) bf16 inputs/weights straight from the "producer" (no wrapper casts, no
    #    in-kernel casts on x/w1/w2), bf16 output.
    feat_bf = feat.astype(jnp.bfloat16)
    w1_bf, b1_bf, w2_bf, b2_bf = (a.astype(jnp.bfloat16) for a in (w1, b1, w2, b2))
    out = fwd_def(feat_bf, w1_bf, b1_bf, w2_bf, b2_bf)
    jax.block_until_ready(out)
    assert out.dtype == jnp.bfloat16
    ref = ref_fn(feat_bf.astype(jnp.float32), w1_bf.astype(jnp.float32),
                 b1_bf.astype(jnp.float32), w2_bf.astype(jnp.float32),
                 b2_bf.astype(jnp.float32), num_mixture, dim_in)
    assert jnp.allclose(out.astype(jnp.float32), ref, atol=5e-2, rtol=5e-2), \
        "bf16-input mismatch vs reference"

    # -------- Config B: padding-path regression (dim_out=72, padded to 128) --------
    dim_in2, num_mixture2 = 24, 3          # dim_hidden=24, dim_out=72
    w1p, b1p, w2p, b2p = init_mlp_mapper_params(jax.random.fold_in(k_params, 7),
                                                dim_in2, num_mixture2)
    batch = 16
    featp = jax.random.normal(jax.random.fold_in(k_feat, 2), (batch, dim_in2), jnp.float32)
    fwd_pad = jax.jit(partial(mlp_mapper_forward, num_mixture=num_mixture2, dim_in=dim_in2,
                              compute_dtype=jnp.float32, out_dtype=jnp.float32))
    outp = fwd_pad(featp, w1p, b1p, w2p, b2p)
    jax.block_until_ready(outp)
    assert outp.shape == (batch, num_mixture2, dim_in2), outp.shape
    refp = ref_fn(featp, w1p, b1p, w2p, b2p, num_mixture2, dim_in2)
    assert jnp.allclose(outp, refp, atol=1e-5, rtol=1e-5), "padded-dim_out mismatch vs reference"

    print("KERNEL_OK")
</pallas_src>

<mosaic_0001>
module attributes {stable_mosaic.version = 11 : i64} {
  func.func @_mlp_mapper_kernel(%arg0: i32, %arg1: memref<8x32xf32, #tpu.memory_space<vmem>>, %arg2: memref<32x64xf32, #tpu.memory_space<vmem>>, %arg3: memref<1x64xf32, #tpu.memory_space<vmem>>, %arg4: memref<64x128xf32, #tpu.memory_space<vmem>>, %arg5: memref<1x128xf32, #tpu.memory_space<vmem>>, %arg6: memref<8x128xf32, #tpu.memory_space<vmem>>) attributes {dimension_semantics = [#tpu.dimension_semantics<parallel>], iteration_bounds = array<i64: 1>, scalar_prefetch = 0 : i64, scratch_operands = 0 : i64, tpu.core_type = #tpu.core_type<tc>, window_params = [{transform_indices = @transform_0, window_bounds = array<i64: 8, 32>}, {pipeline_mode = #tpu.pipeline_mode<synchronous>, transform_indices = @transform_1, window_bounds = array<i64: 32, 64>}, {pipeline_mode = #tpu.pipeline_mode<synchronous>, transform_indices = @transform_2, window_bounds = array<i64: 1, 64>}, {pipeline_mode = #tpu.pipeline_mode<synchronous>, transform_indices = @transform_3, window_bounds = array<i64: 64, 128>}, {pipeline_mode = #tpu.pipeline_mode<synchronous>, transform_indices = @transform_4, window_bounds = array<i64: 1, 128>}, {transform_indices = @transform_5, window_bounds = array<i64: 8, 128>}]} {
    %c0 = arith.constant 0 : index
    %c0_0 = arith.constant 0 : index
    %0 = vector.load %arg1[%c0, %c0_0] : memref<8x32xf32, #tpu.memory_space<vmem>>, vector<8x32xf32>
    %c0_1 = arith.constant 0 : index
    %c0_2 = arith.constant 0 : index
    %1 = vector.load %arg2[%c0_1, %c0_2] : memref<32x64xf32, #tpu.memory_space<vmem>>, vector<32x64xf32>
    %cst = arith.constant dense<0.000000e+00> : vector<8x64xf32>
    %2 = tpu.matmul %0, %1, %cst {dimension_numbers = #tpu.dot_dimension_numbers<[1], [0], [0], [1], [0, 0, 1, 1], [], []>, precision = #tpu.contract_precision<fp32>} : vector<8x32xf32>, vector<32x64xf32>, vector<8x64xf32> -> vector<8x64xf32>
    %c0_3 = arith.constant 0 : index
    %c0_4 = arith.constant 0 : index
    %3 = vector.load %arg3[%c0_3, %c0_4] : memref<1x64xf32, #tpu.memory_space<vmem>>, vector<1x64xf32>
    %4 = vector.broadcast %3 : vector<1x64xf32> to vector<8x64xf32>
    %5 = arith.addf %2, %4 : vector<8x64xf32>
    %cst_5 = arith.constant 0.000000e+00 : f32
    %6 = vector.broadcast %cst_5 : f32 to vector<8x64xf32>
    %7 = arith.maximumf %5, %6 : vector<8x64xf32>
    %c0_6 = arith.constant 0 : index
    %c0_7 = arith.constant 0 : index
    %8 = vector.load %arg4[%c0_6, %c0_7] : memref<64x128xf32, #tpu.memory_space<vmem>>, vector<64x128xf32>
    %cst_8 = arith.constant dense<0.000000e+00> : vector<8x128xf32>
    %9 = tpu.matmul %7, %8, %cst_8 {dimension_numbers = #tpu.dot_dimension_numbers<[1], [0], [0], [1], [0, 0, 1, 1], [], []>, precision = #tpu.contract_precision<fp32>} : vector<8x64xf32>, vector<64x128xf32>, vector<8x128xf32> -> vector<8x128xf32>
    %c0_9 = arith.constant 0 : index
    %c0_10 = arith.constant 0 : index
    %10 = vector.load %arg5[%c0_9, %c0_10] : memref<1x128xf32, #tpu.memory_space<vmem>>, vector<1x128xf32>
    %11 = vector.broadcast %10 : vector<1x128xf32> to vector<8x128xf32>
    %12 = arith.addf %9, %11 : vector<8x128xf32>
    %c0_11 = arith.constant 0 : index
    %c0_12 = arith.constant 0 : index
    %13 = vector.load %arg6[%c0_11, %c0_12] : memref<8x128xf32, #tpu.memory_space<vmem>>, vector<8x128xf32>
    tpu.vector_store %arg6[%c0_11, %c0_12], %12 {strides = array<i32>} : memref<8x128xf32, #tpu.memory_space<vmem>>, vector<8x128xf32>,
    return
  }
  func.func @transform_0(%arg0: i32) -> (i32, i32) {
    %c0_i32 = arith.constant 0 : i32
    %c0_i32_0 = arith.constant 0 : i32
    return %arg0, %c0_i32 : i32, i32
  }
  func.func @transform_1(%arg0: i32) -> (i32, i32) {
    %c0_i32 = arith.constant 0 : i32
    %c0_i32_0 = arith.constant 0 : i32
    %c0_i32_1 = arith.constant 0 : i32
    return %c0_i32, %c0_i32_0 : i32, i32
  }
  func.func @transform_2(%arg0: i32) -> (i32, i32) {
    %c0_i32 = arith.constant 0 : i32
    %c0_i32_0 = arith.constant 0 : i32
    %c0_i32_1 = arith.constant 0 : i32
    return %c0_i32, %c0_i32_0 : i32, i32
  }
  func.func @transform_3(%arg0: i32) -> (i32, i32) {
    %c0_i32 = arith.constant 0 : i32
    %c0_i32_0 = arith.constant 0 : i32
    %c0_i32_1 = arith.constant 0 : i32
    return %c0_i32, %c0_i32_0 : i32, i32
  }
  func.func @transform_4(%arg0: i32) -> (i32, i32) {
    %c0_i32 = arith.constant 0 : i32
    %c0_i32_0 = arith.constant 0 : i32
    %c0_i32_1 = arith.constant 0 : i32
    return %c0_i32, %c0_i32_0 : i32, i32
  }
  func.func @transform_5(%arg0: i32) -> (i32, i32) {
    %c0_i32 = arith.constant 0 : i32
    %c0_i32_0 = arith.constant 0 : i32
    return %arg0, %c0_i32 : i32, i32
  }
}

</mosaic_0001>

<bundles_post_ra>
// kernel: mlp_mapper_forward.1
= control target key start
LH: loop header
LB: loop body
LE: loop exit
PB: predicated region body
PF: predicated region fallthrough
CT: control target
= control target key end

     0   :  { %10 = vsyncpa [#allocation3], 0  ;;  %s1768_s0 = inlined_call_operand.hbm [shape: f32[8,32], index: 0, kind: input, shape index: {}]   ;;  %s1769_s1 = inlined_call_operand.hbm [shape: f32[32,64], index: 1, kind: input, shape index: {}]   ;;  %s1770_s2 = inlined_call_operand.vmem [shape: f32[1,64], index: 2, kind: input, shape index: {}]   ;;  %s1771_s3 = inlined_call_operand.hbm [shape: f32[64,128], index: 3, kind: input, shape index: {}]   ;;  %s1772_s4 = inlined_call_operand.vmem [shape: f32[1,128], index: 4, kind: input, shape index: {}]   ;;  %s1773_s5 = inlined_call_operand.vmem [shape: f32[8,128], index: 5, kind: output, shape index: {}]  }
   0x1   :  { %11 = vsyncpa [#allocation5], 0  ;;  %s1461_s18 = smov [#allocation4]  }
   0x2   :  { %s27_s19 = sshll.u32 %s1461_s18, 4  ;;  %s28_s19 = int_to_ptr.vmem [resolvable:$true] %s27_s19 }
   0x3   :  { %s1405_s20 = scalar_lea.vmem %s28_s19, 512  ;;  %p1410_p1 = scmp.lt.s32.totalorder %s28_s19, %s28_s19 }
   0x4   :  { %p1406_p0 = scmp.ne.s32.totalorder %s28_s19, %s1405_s20  ;;  %p1411_p2 = scmp.lt.s32.totalorder %s1405_s20, %s1405_s20 }
   0x6   :  { %p1412_p3 = por %p1411_p2, %p1410_p1 }
   0x8   :  { %p1413_p4 = pnand %p1412_p3, %p1406_p0 }
   0xa   :  { %1416 = shalt.err (!%p1413_p4)
}
   0xb   :  { %s1462_s21 = smov 128   ;;  %s1463_s22 = smov 8  }
   0xc   :  { %33 = dma.hbm_to_vmem [thread:$0]  %s1769_s1, 512, %s28_s19, [#allocation5], %s1462_s21, %s1462_s21, %s1463_s22  }
   0xd   :  { %s1464_s25 = smov [#allocation2]   ;;  %s1465_s27 = smov [#allocation6]  }
   0xe   :  { %s18_s26 = sshll.u32 %s1464_s25, 4  ;;  %s41_s28 = sshll.u32 %s1465_s27, 4  ;;  %s19_s26 = int_to_ptr.vmem [resolvable:$true] %s18_s26  ;;  %s42_s28 = int_to_ptr.vmem [resolvable:$true] %s41_s28 }
   0xf   :  { %s1425_s29 = scalar_lea.vmem %s19_s26, 128  ;;  %p1430_p6 = scmp.lt.s32.totalorder %s19_s26, %s19_s26 }
  0x10   :  { %p1426_p5 = scmp.ne.s32.totalorder %s19_s26, %s1425_s29  ;;  %p1431_p7 = scmp.lt.s32.totalorder %s1425_s29, %s1425_s29 }
  0x12   :  { %p1432_p8 = por %p1431_p7, %p1430_p6 }
  0x14   :  { %p1433_p9 = pnand %p1432_p8, %p1426_p5 }
  0x16   :  { %1436 = shalt.err (!%p1433_p9)
}
  0x17   :  { %21 = dma.hbm_to_vmem [thread:$0]  %s1768_s0, 128, %s19_s26, [#allocation3]  }
  0x18   :  { %s1445_s7 = scalar_lea.vmem %s42_s28, 1024  ;;  %p1450_p11 = scmp.lt.s32.totalorder %s42_s28, %s42_s28 }
  0x19   :  { %p1446_p10 = scmp.ne.s32.totalorder %s42_s28, %s1445_s7  ;;  %p1451_p12 = scmp.lt.s32.totalorder %s1445_s7, %s1445_s7 }
  0x1b   :  { %p1452_p13 = por %p1451_p12, %p1450_p11 }
  0x1d   :  { %p1453_p0 = pnand %p1452_p13, %p1446_p10 }
  0x1f   :  { %1456 = shalt.err (!%p1453_p0)
}
  0x20   :  { %47 = dma.hbm_to_vmem [thread:$0]  %s1771_s3, 1024, %s42_s28, [#allocation5], %s1462_s21, %s1462_s21, %s1463_s22  }
  0x21   :  { %1457 = dma.done.wait [#allocation3], 128  }
  0x22   :  { %1458 = vsyncadd [#allocation3], 4294967168 }
  0x23   :  { %1459 = dma.done.wait [#allocation5], 1536  }
  0x24   :  { %1460 = vsyncadd [#allocation5], 4294965760  ;;  %v1466_v0 = vmov 0.0   ;;  %vm1467_vm0 = vmmov 0   ;;  %vm71_vm1 = vcmask 261120   ;;  %v63_v1 = vld [vmem:[#allocation4 + $0x18] sm:$0xff] }
  0x25   :  { %1210 = vmatprep.subr.mxu0 %v1466_v0  ;;  %1221 = vmatprep.subr.mxu1 %v1466_v0  ;;  %v62_v2 = vld [vmem:[#allocation4 + $0x10] sm:$0xff]  ;;  %v61_v3 = vld [vmem:[#allocation4 + $0x8] sm:$0xff]  ;;  %v1513_v4 = vand.u32 4294901760, %v63_v1  ;;  %v60_v7 = vld [vmem:[#allocation4] sm:$0xff]  ;;  %vm576_vm2 = vcmask 523264  }
  0x26   :  { %1218 = vmatprep.mubr.msk.f32.mxu0 %vm1467_vm0, %v1466_v0  ;;  %1229 = vmatprep.mubr.msk.f32.mxu1 %vm1467_vm0, %v1466_v0  ;;  %v1515_v5 = vand.u32 4294901760, %v62_v2  ;;  %v1517_v6 = vand.u32 4294901760, %v61_v3  ;;  %v59_v8 = vld [vmem:[#allocation2] sm:$0xff]  ;;  %v1519_v9 = vand.u32 4294901760, %v60_v7  ;;  %v567_v34 = vld [vmem:[#allocation6 + $0x30] sm:$0xff]  ;;  %v566_v37 = vld [vmem:[#allocation6 + $0x28] sm:$0xff] }
  0x27   :  { %v73_v10 = vsel %vm71_vm1, %v59_v8, 0  ;;  %1211 = vmatpush3.msra.mxu0 %v1513_v4  ;;  %v180_v11 = vsub.f32 %v63_v1, %v1513_v4  ;;  %v568_v32 = vld [vmem:[#allocation6 + $0x38] sm:$0xff]  ;;  %v1584_v36 = vand.u32 4294901760, %v567_v34  ;;  %v1592_v40 = vand.u32 4294901760, %v566_v37  ;;  %v565_v41 = vld [vmem:[#allocation6 + $0x20] sm:$0xff]  ;;  %v563_v52 = vld [vmem:[#allocation6 + $0x10] sm:$0xff] }
  0x28   :  { %v1523_v12 = vand.u32 4294901760, %v73_v10  ;;  %v187_v13 = vsub.f32 %v62_v2, %v1515_v5  ;;  %v194_v14 = vsub.f32 %v61_v3, %v1517_v6  ;;  %1212 = vmatprep.subr.mxu0 %v1466_v0  ;;  %v201_v15 = vsub.f32 %v60_v7, %v1519_v9  ;;  %v564_v46 = vld [vmem:[#allocation6 + $0x18] sm:$0xff]  ;;  %v562_v58 = vld [vmem:[#allocation6 + $0x8] sm:$0xff]  ;;  %v561_v1 = vld [vmem:[#allocation6] sm:$0xff] }
  0x29   :  { %1213 = vmatpush3.msra.mxu0 %v1515_v5  ;;  %v181_v16 = vand.u32 4294901760, %v180_v11  ;;  %v1579_v33 = vand.u32 4294901760, %v568_v32  ;;  %v1590_v39 = vsub.f32 %v567_v34, %v1584_v36  ;;  %v1601_v44 = vsub.f32 %v566_v37, %v1592_v40 }
  0x2a   :  { %v145_v17 = vsub.f32 %v73_v10, %v1523_v12  ;;  %v188_v18 = vand.u32 4294901760, %v187_v13  ;;  %v195_v19 = vand.u32 4294901760, %v194_v14  ;;  %1214 = vmatprep.subr.mxu0 %v1466_v0  ;;  %v202_v20 = vand.u32 4294901760, %v201_v15 }
  0x2b   :  { %1215 = vmatpush3.msra.mxu0 %v1517_v6  ;;  %v182_v21 = vsub.f32 %v180_v11, %v181_v16  ;;  %v1582_v35 = vsub.f32 %v568_v32, %v1579_v33  ;;  %v689_v43 = vand.u32 4294901760, %v1590_v39  ;;  %v1603_v45 = vand.u32 4294901760, %v565_v41 }
  0x2c   :  { %v146_v22 = vand.u32 4294901760, %v145_v17  ;;  %v189_v23 = vsub.f32 %v187_v13, %v188_v18  ;;  %v196_v24 = vsub.f32 %v194_v14, %v195_v19  ;;  %1216 = vmatprep.subr.mxu0 %v1466_v0  ;;  %v203_v28 = vsub.f32 %v201_v15, %v202_v20 }
  0x2d   :  { %1217 = vmatpush3.msra.mxu0 %v1519_v9  ;;  %v183_v25 = vand.u32 4294901760, %v182_v21  ;;  %v682_v38 = vand.u32 4294901760, %v1582_v35  ;;  %v690_v48 = vsub.f32 %v1590_v39, %v689_v43  ;;  %v696_v49 = vand.u32 4294901760, %v1601_v44 }
  0x2e   :  { %v147_v26 = vsub.f32 %v145_v17, %v146_v22  ;;  %v190_v27 = vand.u32 4294901760, %v189_v23  ;;  %1232 = vmatprep.subr.mxu0 %v1466_v0  ;;  %v197_v30 = vand.u32 4294901760, %v196_v24  ;;  %v204_v31 = vand.u32 4294901760, %v203_v28 }
  0x2f   :  { %1222 = vmatpush3.msra.mxu1 %v183_v25  ;;  %v683_v42 = vsub.f32 %v1582_v35, %v682_v38  ;;  %v1612_v50 = vsub.f32 %v565_v41, %v1603_v45  ;;  %v1615_v51 = vand.u32 4294901760, %v564_v46  ;;  %v691_v53 = vand.u32 4294901760, %v690_v48 }
  0x30   :  { %v148_v29 = vand.u32 4294901760, %v147_v26  ;;  %1223 = vmatprep.subr.mxu1 %v1466_v0  ;;  %v697_v54 = vsub.f32 %v1601_v44, %v696_v49  ;;  %v1622_v56 = vand.u32 4294901760, %v563_v52  ;;  %v1635_v62 = vand.u32 4294901760, %v562_v58 }
  0x31   :  { %1224 = vmatpush3.msra.mxu1 %v190_v27  ;;  %v684_v47 = vand.u32 4294901760, %v683_v42  ;;  %v703_v55 = vand.u32 4294901760, %v1612_v50  ;;  %v1626_v57 = vsub.f32 %v564_v46, %v1615_v51 }
  0x32   :  { %1219 = vmatmul.mubr.f32.vlgmr.msra.gmra.mxu0 %v148_v29  ;;  %1225 = vmatprep.subr.mxu1 %v1466_v0  ;;  %v698_v59 = vand.u32 4294901760, %v697_v54  ;;  %v1633_v61 = vsub.f32 %v563_v52, %v1622_v56 }
  0x33   :  { %1233 = vmatpush3.msra.mxu0 %v180_v11  ;;  %1226 = vmatpush3.msra.mxu1 %v197_v30  ;;  %v704_v60 = vsub.f32 %v1612_v50, %v703_v55  ;;  %v710_v63 = vand.u32 4294901760, %v1626_v57 }
  0x34   :  { %1234 = vmatprep.subr.mxu0 %v1466_v0  ;;  %1227 = vmatprep.subr.mxu1 %v1466_v0  ;;  %v717_v3 = vand.u32 4294901760, %v1633_v61 }
  0x35   :  { %1235 = vmatpush3.msra.mxu0 %v187_v13  ;;  %1228 = vmatpush3.msra.mxu1 %v204_v31  ;;  %v705_v2 = vand.u32 4294901760, %v704_v60 }
  0x36   :  { %1236 = vmatprep.subr.mxu0 %v1466_v0  ;;  %1230 = vmatmul.mubr.f32.vlgmr.msra.gmra.mxu1 %v1523_v12  ;;  %v718_v7 = vsub.f32 %v1633_v61, %v717_v3 }
  0x37   :  { %1237 = vmatpush3.msra.mxu0 %v194_v14  ;;  %1243 = vmatprep.subr.mxu1 %v1466_v0 }
  0x38   :  { %1238 = vmatprep.subr.mxu0 %v1466_v0  ;;  %1244 = vmatpush3.msra.mxu1 %v1513_v4  ;;  %v719_v11 = vand.u32 4294901760, %v718_v7 }
  0x39   :  { %1239 = vmatpush3.msra.mxu0 %v201_v15  ;;  %1240 = vmatprep.mubr.msk.f32.mxu0 %vm1467_vm0, %v1466_v0 }
  0x3a   :  { %1245 = vmatprep.subr.mxu1 %v1466_v0  ;;  %1254 = vmatprep.subr.mxu0 %v1466_v0 }
  0x3b   :  { %1241 = vmatmul.mubr.f32.vlgmr.msra.gmra.mxu0 %v145_v17  ;;  %1246 = vmatpush3.msra.mxu1 %v1515_v5 }
  0x3c   :  { %1255 = vmatpush3.msra.mxu0 %v181_v16  ;;  %1247 = vmatprep.subr.mxu1 %v1466_v0 }
  0x3d   :  { %1256 = vmatprep.subr.mxu0 %v1466_v0  ;;  %1248 = vmatpush3.msra.mxu1 %v1517_v6 }
  0x3e   :  { %1257 = vmatpush3.msra.mxu0 %v188_v18  ;;  %1249 = vmatprep.subr.mxu1 %v1466_v0 }
  0x3f   :  { %1258 = vmatprep.subr.mxu0 %v1466_v0  ;;  %1250 = vmatpush3.msra.mxu1 %v1519_v9 }
  0x40   :  { %1251 = vmatprep.mubr.msk.f32.mxu1 %vm1467_vm0, %v1466_v0  ;;  %1259 = vmatpush3.msra.mxu0 %v195_v19 }
  0x41   :  { %1252 = vmatmul.mubr.f32.vlgmr.msra.gmra.mxu1 %v146_v22  ;;  %1260 = vmatprep.subr.mxu0 %v1466_v0 }
  0x42   :  { %1265 = vmatprep.subr.mxu1 %v1466_v0  ;;  %1261 = vmatpush3.msra.mxu0 %v202_v20  ;;  %v1124_v20 = vld [vmem:[%s1770_s2] ss:$0 sm:$0xff] }
  0x43   :  { %1262 = vmatprep.mubr.msk.f32.mxu0 %vm1467_vm0, %v1466_v0  ;;  %1266 = vmatpush3.msra.mxu1 %v1513_v4  ;;  %v1643_v4 = vsub.f32 %v562_v58, %v1635_v62 }
  0x44   :  { %1263 = vmatmul.mubr.f32.vlgmr.msra.gmra.mxu0 %v1523_v12  ;;  %1267 = vmatprep.subr.mxu1 %v1466_v0 }
  0x45   :  { %1273 = vmatprep.mubr.msk.f32.mxu1 %vm1467_vm0, %v1466_v0  ;;  %1268 = vmatpush3.msra.mxu1 %v1515_v5  ;;  %v1645_v5 = vand.u32 4294901760, %v561_v1  ;;  %v724_v8 = vand.u32 4294901760, %v1643_v4 }
  0x46   :  { %1276 = vmatprep.subr.mxu0 %v1466_v0  ;;  %1269 = vmatprep.subr.mxu1 %v1466_v0 }
  0x47   :  { %1292 = vmatprep.mubr.msk.f32.mxu0 %vm1467_vm0, %v1466_v0  ;;  %1270 = vmatpush3.msra.mxu1 %v1517_v6  ;;  %v711_v6 = vsub.f32 %v1626_v57, %v710_v63 }
  0x48   :  { %1271 = vmatprep.subr.mxu1 %v1466_v0  ;;  %1277 = vmatpush3.msra.mxu0 %v1579_v33 }
  0x49   :  { %1272 = vmatpush3.msra.mxu1 %v1519_v9  ;;  %1278 = vmatprep.subr.mxu0 %v1466_v0  ;;  %v1658_v9 = vsub.f32 %v561_v1, %v1645_v5  ;;  %v712_v10 = vand.u32 4294901760, %v711_v6 }
  0x4a   :  { %1274 = vmatmul.mubr.f32.vlgmr.msra.gmra.mxu1 %v1523_v12  ;;  %1295 = vmatprep.subr.mxu1 %v1466_v0  ;;  %v725_v12 = vsub.f32 %v1643_v4, %v724_v8 }
  0x4b   :  { %1311 = vmatprep.mubr.msk.f32.mxu1 %vm1467_vm0, %v1466_v0  ;;  %1279 = vmatpush3.msra.mxu0 %v1584_v36  ;;  %v731_v13 = vand.u32 4294901760, %v1658_v9 }
  0x4c   :  { %1280 = vmatprep.subr.mxu0 %v1466_v0  ;;  %1296 = vmatpush3.msra.mxu1 %v684_v47  ;;  %v726_v14 = vand.u32 4294901760, %v725_v12 }
  0x4d   :  { %1281 = vmatpush3.msra.mxu0 %v1592_v40  ;;  %1297 = vmatprep.subr.mxu1 %v1466_v0  ;;  %v732_v15 = vsub.f32 %v1658_v9, %v731_v13 }
  0x4e   :  { %1282 = vmatprep.subr.mxu0 %v1466_v0  ;;  %1298 = vmatpush3.msra.mxu1 %v691_v53 }
  0x4f   :  { %1283 = vmatpush3.msra.mxu0 %v1603_v45  ;;  %1299 = vmatprep.subr.mxu1 %v1466_v0  ;;  %v733_v16 = vand.u32 4294901760, %v732_v15 }
  0x50   :  { %1284 = vmatprep.subr.mxu0 %v1466_v0  ;;  %1300 = vmatpush3.msra.mxu1 %v698_v59 }
  0x51   :  { %1285 = vmatpush3.msra.mxu0 %v1615_v51  ;;  %1301 = vmatprep.subr.mxu1 %v1466_v0 }
  0x52   :  { %1286 = vmatprep.subr.mxu0 %v1466_v0  ;;  %1302 = vmatpush3.msra.mxu1 %v705_v2 }
  0x53   :  { %1287 = vmatpush3.msra.mxu0 %v1622_v56  ;;  %1303 = vmatprep.subr.mxu1 %v1466_v0 }
  0x54   :  { %1288 = vmatprep.subr.mxu0 %v1466_v0  ;;  %1304 = vmatpush3.msra.mxu1 %v712_v10 }
  0x55   :  { %1289 = vmatpush3.msra.mxu0 %v1635_v62  ;;  %1305 = vmatprep.subr.mxu1 %v1466_v0 }
  0x56   :  { %1290 = vmatprep.subr.mxu0 %v1466_v0  ;;  %1306 = vmatpush3.msra.mxu1 %v719_v11 }
  0x57   :  { %1291 = vmatpush3.msra.mxu0 %v1645_v5  ;;  %1307 = vmatprep.subr.mxu1 %v1466_v0 }
  0x58   :  { %1314 = vmatprep.subr.mxu0 %v1466_v0  ;;  %1308 = vmatpush3.msra.mxu1 %v726_v14 }
  0x59   :  { %1309 = vmatprep.subr.mxu1 %v1466_v0 }
  0x5a   :  { %1310 = vmatpush3.msra.mxu1 %v733_v16 }
  0x5b   :  { %1333 = vmatprep.subr.mxu1 %v1466_v0 }
  0xf2   :  { %v150_v17 = vpop.f32.mrf.mxu0 }
  0xf3   :  { %v151_v23 = vadd.f32 %v1124_v20, %v150_v17 }
  0xf4   :  { %v1220_v18 = vpop.f32.mrf.mxu0 }
  0xf6   :  { %v241_v19 = vpop.f32.mrf.mxu1 }
  0xf7   :  { %v242_v25 = vadd.f32 %v241_v19, %v151_v23 }
  0xf8   :  { %v1231_v21 = vpop.f32.mrf.mxu1 }
  0xfb   :  { %v321_v22 = vpop.f32.mrf.mxu0 }
  0xfc   :  { %v322_v28 = vadd.f32 %v321_v22, %v242_v25 }
  0xfd   :  { %v1242_v24 = vpop.f32.mrf.mxu0 }
 0x101   :  { %v398_v26 = vpop.f32.mrf.mxu1 }
 0x102   :  { %v399_v30 = vadd.f32 %v398_v26, %v322_v28 }
 0x103   :  { %v1253_v27 = vpop.f32.mrf.mxu1 }
 0x104   :  { %v481_v29 = vpop.f32.mrf.mxu0 }
 0x105   :  { %v482_v32 = vadd.f32 %v481_v29, %v399_v30 }
 0x106   :  { %v1264_v31 = vpop.f32.mrf.mxu0 }
 0x10a   :  { %v556_v34 = vpop.f32.mrf.mxu1 }
 0x10b   :  { %v557_v37 = vadd.f32 %v556_v34, %v482_v32 }
 0x10c   :  { %v1275_v41 = vpop.f32.mrf.mxu1 }
 0x10d   :  { %v560_v42 = vmax.f32 %v557_v37, 0.0 }
 0x10f   :  { %v578_v46 = vsel %vm576_vm2, %v560_v42, 0 }
 0x110   :  { %v1678_v47 = vand.u32 4294901760, %v578_v46 }
 0x112   :  { %v654_v48 = vsub.f32 %v578_v46, %v1678_v47  ;;  %1312 = vmatmul.mubr.f32.vlgmr.msra.gmra.mxu1 %v1678_v47 }
 0x113   :  { %1334 = vmatpush3.msra.mxu1 %v1579_v33  ;;  %1349 = vmatprep.mubr.msk.f32.mxu1 %vm1467_vm0, %v1466_v0 }
 0x114   :  { %v655_v52 = vand.u32 4294901760, %v654_v48  ;;  %1335 = vmatprep.subr.mxu1 %v1466_v0 }
 0x115   :  { %1336 = vmatpush3.msra.mxu1 %v1584_v36 }
 0x116   :  { %1337 = vmatprep.subr.mxu1 %v1466_v0  ;;  %v656_v53 = vsub.f32 %v654_v48, %v655_v52 }
 0x117   :  { %1338 = vmatpush3.msra.mxu1 %v1592_v40 }
 0x118   :  { %1339 = vmatprep.subr.mxu1 %v1466_v0  ;;  %v657_v54 = vand.u32 4294901760, %v656_v53 }
 0x119   :  { %1340 = vmatpush3.msra.mxu1 %v1603_v45 }
 0x11a   :  { %1341 = vmatprep.subr.mxu1 %v1466_v0  ;;  %1293 = vmatmul.mubr.f32.vlgmr.msra.gmra.mxu0 %v657_v54 }
 0x11b   :  { %1315 = vmatpush3.msra.mxu0 %v1582_v35  ;;  %1342 = vmatpush3.msra.mxu1 %v1615_v51 }
 0x11c   :  { %1316 = vmatprep.subr.mxu0 %v1466_v0  ;;  %1343 = vmatprep.subr.mxu1 %v1466_v0 }
 0x11d   :  { %1317 = vmatpush3.msra.mxu0 %v1590_v39  ;;  %1344 = vmatpush3.msra.mxu1 %v1622_v56 }
 0x11e   :  { %1318 = vmatprep.subr.mxu0 %v1466_v0  ;;  %1345 = vmatprep.subr.mxu1 %v1466_v0 }
 0x11f   :  { %1319 = vmatpush3.msra.mxu0 %v1601_v44  ;;  %1346 = vmatpush3.msra.mxu1 %v1635_v62 }
 0x120   :  { %1320 = vmatprep.subr.mxu0 %v1466_v0  ;;  %1347 = vmatprep.subr.mxu1 %v1466_v0 }
 0x121   :  { %1321 = vmatpush3.msra.mxu0 %v1612_v50  ;;  %1348 = vmatpush3.msra.mxu1 %v1645_v5 }
 0x122   :  { %1322 = vmatprep.subr.mxu0 %v1466_v0  ;;  %1350 = vmatmul.mubr.f32.vlgmr.msra.gmra.mxu1 %v655_v52 }
 0x123   :  { %1371 = vmatprep.subr.mxu1 %v1466_v0  ;;  %1323 = vmatpush3.msra.mxu0 %v1626_v57 }
 0x124   :  { %1372 = vmatpush3.msra.mxu1 %v1579_v33  ;;  %1324 = vmatprep.subr.mxu0 %v1466_v0 }
 0x125   :  { %1373 = vmatprep.subr.mxu1 %v1466_v0  ;;  %1325 = vmatpush3.msra.mxu0 %v1633_v61 }
 0x126   :  { %1374 = vmatpush3.msra.mxu1 %v1584_v36  ;;  %1326 = vmatprep.subr.mxu0 %v1466_v0 }
 0x127   :  { %1375 = vmatprep.subr.mxu1 %v1466_v0  ;;  %1327 = vmatpush3.msra.mxu0 %v1643_v4 }
 0x128   :  { %1376 = vmatpush3.msra.mxu1 %v1592_v40  ;;  %1328 = vmatprep.subr.mxu0 %v1466_v0 }
 0x129   :  { %1377 = vmatprep.subr.mxu1 %v1466_v0  ;;  %1329 = vmatpush3.msra.mxu0 %v1658_v9 }
 0x12a   :  { %1330 = vmatprep.mubr.msk.f32.mxu0 %vm1467_vm0, %v1466_v0  ;;  %1378 = vmatpush3.msra.mxu1 %v1603_v45  ;;  %v1125_v45 = vld [vmem:[%s1772_s4] ss:$0 sm:$0xff] }
 0x12b   :  { %1331 = vmatmul.mubr.f32.vlgmr.msra.gmra.mxu0 %v654_v48  ;;  %1352 = vmatprep.subr.mxu0 %v1466_v0 }
 0x12c   :  { %1379 = vmatprep.subr.mxu1 %v1466_v0  ;;  %1353 = vmatpush3.msra.mxu0 %v682_v38 }
 0x12d   :  { %1380 = vmatpush3.msra.mxu1 %v1615_v51  ;;  %1354 = vmatprep.subr.mxu0 %v1466_v0 }
 0x12e   :  { %1381 = vmatprep.subr.mxu1 %v1466_v0  ;;  %1355 = vmatpush3.msra.mxu0 %v689_v43 }
 0x12f   :  { %1382 = vmatpush3.msra.mxu1 %v1622_v56  ;;  %1356 = vmatprep.subr.mxu0 %v1466_v0 }
 0x130   :  { %1383 = vmatprep.subr.mxu1 %v1466_v0  ;;  %1357 = vmatpush3.msra.mxu0 %v696_v49 }
 0x131   :  { %1384 = vmatpush3.msra.mxu1 %v1635_v62  ;;  %1358 = vmatprep.subr.mxu0 %v1466_v0 }
 0x132   :  { %1385 = vmatprep.subr.mxu1 %v1466_v0  ;;  %1359 = vmatpush3.msra.mxu0 %v703_v55 }
 0x133   :  { %1386 = vmatpush3.msra.mxu1 %v1645_v5  ;;  %1387 = vmatprep.mubr.msk.f32.mxu1 %vm1467_vm0, %v1466_v0 }
 0x134   :  { %1360 = vmatprep.subr.mxu0 %v1466_v0  ;;  %1388 = vmatmul.mubr.f32.vlgmr.msra.gmra.mxu1 %v1678_v47 }
 0x135   :  { %1361 = vmatpush3.msra.mxu0 %v710_v63  ;;  %1368 = vmatprep.mubr.msk.f32.mxu0 %vm1467_vm0, %v1466_v0 }
 0x136   :  { %1362 = vmatprep.subr.mxu0 %v1466_v0 }
 0x137   :  { %1363 = vmatpush3.msra.mxu0 %v717_v3 }
 0x138   :  { %1364 = vmatprep.subr.mxu0 %v1466_v0 }
 0x139   :  { %1365 = vmatpush3.msra.mxu0 %v724_v8 }
 0x13a   :  { %1366 = vmatprep.subr.mxu0 %v1466_v0 }
 0x13b   :  { %1367 = vmatpush3.msra.mxu0 %v731_v13 }
 0x13c   :  { %1369 = vmatmul.mubr.f32.vlgmr.msra.gmra.mxu0 %v1678_v47 }
 0x1d2   :  { %v770_v33 = vpop.f32.mrf.mxu1 }
 0x1d4   :  { %v1313_v35 = vpop.f32.mrf.mxu1 }
 0x1da   :  { %v659_v36 = vpop.f32.mrf.mxu0 }
 0x1db   :  { %v660_v49 = vadd.f32 %v1125_v45, %v659_v36 }
 0x1dc   :  { %v1294_v38 = vpop.f32.mrf.mxu0 }
 0x1dd   :  { %v771_v0 = vadd.f32 %v770_v33, %v660_v49 }
 0x1e2   :  { %v939_v39 = vpop.f32.mrf.mxu1 }
 0x1e4   :  { %v1351_v40 = vpop.f32.mrf.mxu1 }
 0x1eb   :  { %v858_v43 = vpop.f32.mrf.mxu0 }
 0x1ec   :  { %v859_v55 = vadd.f32 %v858_v43, %v771_v0 }
 0x1ed   :  { %v1332_v44 = vpop.f32.mrf.mxu0 }
 0x1ee   :  { %v940_v56 = vadd.f32 %v939_v39, %v859_v55 }
 0x1f4   :  { %v1113_v50 = vpop.f32.mrf.mxu1 }
 0x1f6   :  { %v1389_v51 = vpop.f32.mrf.mxu1 }
 0x1fc   :  { %v1034_v57 = vpop.f32.mrf.mxu0 }
 0x1fd   :  { %v1035_v58 = vadd.f32 %v1034_v57, %v940_v56 }
 0x1fe   :  { %v1370_v59 = vpop.f32.mrf.mxu0 }
 0x1ff   :  { %v1114_v60 = vadd.f32 %v1113_v50, %v1035_v58 }
 0x201   :  { %1117 = vst [vmem:[%s1773_s5] sm:$0xff] %v1114_v60 }
 0x202   :  { %1122 = vsyncpa [#allocation3], 1 }
 0x203   :  { %1123 = vsyncpa [#allocation5], 1 }

</bundles_post_ra>
